<compile_context>
chip_gen: v7x
topology: tpu7x:2x2x1
jax: 0.10.0
libtpu: 0.0.40
codegen_flags: <defaults>
</compile_context>

<pallas_src>
import jax
import jax.numpy as jnp
from jax.experimental import pallas as pl
from jax.experimental.pallas import tpu as pltpu


def _make_divisible(v, divisor, min_value=None):
    if min_value is None:
        min_value = divisor
    new_v = max(min_value, int(v + divisor / 2) // divisor * divisor)
    if new_v < 0.9 * v:
        new_v += divisor
    return new_v


def _round_up(v, m):
    return ((v + m - 1) // m) * m


def _se_kernel(x_ref, w1t_ref, b1_ref, w2t_ref, b2_ref, o_ref):
    """One batch tile of the SE layer.

    x_ref / o_ref: (TB, C, HW)   (NCHW kept; HW on the lane axis)
    w1t_ref: (C, SQ), b1_ref: (1, SQ), w2t_ref: (SQ, C), b2_ref: (1, C)
    """
    x = x_ref[...]                                            # native dtype

    # Squeeze: adaptive average pool over the spatial axis, f32 accumulation
    # without materialising a full-block f32 copy of x.
    pooled = jnp.mean(x, axis=2, dtype=jnp.float32)           # (TB, C)

    # Excitation MLP (weights pre-transposed in the wrapper, VMEM-resident).
    h = jnp.dot(pooled, w1t_ref[...],
                preferred_element_type=jnp.float32) + b1_ref[...]   # (TB, SQ)
    h = jnp.maximum(h, 0.0)                                          # ReLU
    s = jnp.dot(h, w2t_ref[...],
                preferred_element_type=jnp.float32) + b2_ref[...]    # (TB, C)
    scale = jnp.clip(s + 3.0, 0.0, 6.0) * (1.0 / 6.0)                # Hardsigmoid

    # Scale: broadcast over the spatial axis in the native activation dtype.
    o_ref[...] = x * scale.astype(x.dtype)[:, :, None]


def _vmem_capacity_bytes():
    """Physical VMEM of the local chip; conservative fallback (v7x, 64 MiB)."""
    try:
        cap = getattr(pltpu.get_tpu_info(), "vmem_capacity_bytes", None)
        if cap:
            return int(cap)
    except Exception:
        pass
    return 64 * 1024 * 1024


def _choose_batch_tile(B, C, HW, itemsize):
    """Batch elements per grid step, budgeted on padded (tiled) VMEM bytes."""
    # Sublane packing: 8 rows for 4-byte, 16 for 2-byte, 32 for 1-byte dtypes.
    sublane = max(8, 32 // max(itemsize, 1))
    padded_per_batch = _round_up(C, sublane) * _round_up(HW, 128) * itemsize

    # Auto-pipeline keeps ~4 x blocks live (2-in + 2-out double buffered).
    # Cap the total near 8 MiB -> inside every generation's default scoped
    # VMEM (16 MiB v5e, 32 MiB v6e/v7x) with headroom for weights, in-kernel
    # temporaries and Mosaic internal scratch.
    total_budget = min(_vmem_capacity_bytes() // 8, 8 * 1024 * 1024)
    block_budget = max(total_budget // 4, padded_per_batch)
    tb = max(1, min(B, block_budget // max(padded_per_batch, 1)))

    # Prefer >= 4 grid steps (>= 2 per v7x TensorCore, keeps the double
    # buffer overlapping), but never shrink a block below ~512 KiB.
    if B >= 2:
        steps_cap = max(1, B // 4) if B >= 4 else max(1, B // 2)
        bw_floor = max(1, (512 * 1024) // max(padded_per_batch, 1))
        tb = min(tb, max(steps_cap, min(bw_floor, tb)))
    return max(1, min(tb, B))


def se_layer_pallas(x_nchw, w1, b1, w2, b2):
    """SE layer forward.

    x_nchw: (B, C, H, W).  Weights follow nn.Linear convention:
      w1: (SQ, C), b1: (SQ,), w2: (C, SQ), b2: (C,).
    """
    B, C, H, W = x_nchw.shape
    SQ = w1.shape[0]
    HW = H * W

    # Pre-transpose the tiny weights once (wrapper-side, not per grid step).
    w1t = jnp.transpose(w1)           # (C, SQ)
    w2t = jnp.transpose(w2)           # (SQ, C)
    b1_2d = b1.reshape(1, SQ)
    b2_2d = b2.reshape(1, C)

    # Keep NCHW: (B, C, HW) is a free contiguous reshape -> no extra HBM pass.
    # TODO(synk): for HW in {49, 196} a (TB, C*HW) lane-dense presentation
    # (pool/broadcast handled in-kernel) would remove the 49->128 lane padding
    # and masked stores without any extra HBM pass; kept NCHW here for
    # lowering robustness.
    x = x_nchw.reshape(B, C, HW)

    TB = _choose_batch_tile(B, C, HW, x.dtype.itemsize)
    grid = (pl.cdiv(B, TB),)
    x_block = (TB, C, HW)

    out = pl.pallas_call(
        _se_kernel,
        out_shape=jax.ShapeDtypeStruct(x.shape, x.dtype),
        grid_spec=pltpu.PrefetchScalarGridSpec(
            num_scalar_prefetch=0,
            grid=grid,
            in_specs=[
                pl.BlockSpec(x_block, lambda b: (b, 0, 0)),
                # Weights/biases use constant index maps -> VMEM-resident
                # across the whole grid (no repeated DMA).
                pl.BlockSpec((C, SQ), lambda b: (0, 0)),
                pl.BlockSpec((1, SQ), lambda b: (0, 0)),
                pl.BlockSpec((SQ, C), lambda b: (0, 0)),
                pl.BlockSpec((1, C), lambda b: (0, 0)),
            ],
            out_specs=pl.BlockSpec(x_block, lambda b: (b, 0, 0)),
        ),
        compiler_params=pltpu.CompilerParams(
            dimension_semantics=("parallel",)),
    )(x, w1t, b1_2d, w2t, b2_2d)

    return out.reshape(B, C, H, W)


def se_layer_ref(x, w1, b1, w2, b2):
    """Plain JAX reference matching the PyTorch forward."""
    pooled = jnp.mean(x, axis=(2, 3))                      # (B, C)
    h = jnp.maximum(pooled @ w1.T + b1, 0.0)               # (B, SQ)
    s = h @ w2.T + b2                                      # (B, C)
    scale = jnp.clip(s + 3.0, 0.0, 6.0) / 6.0
    return x * scale[:, :, None, None]


def _run_case(B, C, H, W, reduction, atol, rtol):
    SQ = _make_divisible(C // reduction, 8)
    key = jax.random.PRNGKey(0)
    kx, k1, k2, k3, k4 = jax.random.split(key, 5)
    x = jax.random.normal(kx, (B, C, H, W), dtype=jnp.float32)
    # nn.Linear(C, SQ): weight (SQ, C), bias (SQ,)
    w1 = jax.random.normal(k1, (SQ, C), jnp.float32) * 0.1
    b1 = jax.random.normal(k2, (SQ,), jnp.float32) * 0.1
    # nn.Linear(SQ, C): weight (C, SQ), bias (C,)
    w2 = jax.random.normal(k3, (C, SQ), jnp.float32) * 0.1
    b2 = jax.random.normal(k4, (C,), jnp.float32) * 0.1

    out = jax.block_until_ready(se_layer_pallas(x, w1, b1, w2, b2))
    ref = se_layer_ref(x, w1, b1, w2, b2)
    assert jnp.allclose(out, ref, atol=atol, rtol=rtol), (
        f"mismatch vs reference for shape {(B, C, H, W)}")


if __name__ == "__main__":
    # Primary small case (C=4, HW=256 lane-aligned).
    _run_case(2, 4, 16, 16, reduction=4, atol=1e-5, rtol=1e-5)
    # MobileNet-like case (C=128, HW=49): exercises the unaligned-HW NCHW
    # path.  Slightly looser tolerance: f32 matmuls may take a different MXU
    # multi-pass path in Mosaic vs. XLA's reference dot.
    _run_case(2, 128, 7, 7, reduction=4, atol=2e-3, rtol=2e-3)
    print("KERNEL_OK")
</pallas_src>

<mosaic_0001>
module attributes {stable_mosaic.version = 11 : i64} {
  func.func @_se_kernel(%arg0: i32, %arg1: memref<2x4x256xf32, #tpu.memory_space<vmem>>, %arg2: memref<4x8xf32, #tpu.memory_space<vmem>>, %arg3: memref<1x8xf32, #tpu.memory_space<vmem>>, %arg4: memref<8x4xf32, #tpu.memory_space<vmem>>, %arg5: memref<1x4xf32, #tpu.memory_space<vmem>>, %arg6: memref<2x4x256xf32, #tpu.memory_space<vmem>>) attributes {dimension_semantics = [#tpu.dimension_semantics<parallel>], iteration_bounds = array<i64: 1>, scalar_prefetch = 0 : i64, scratch_operands = 0 : i64, tpu.core_type = #tpu.core_type<tc>, window_params = [{transform_indices = @transform_0, window_bounds = array<i64: 2, 4, 256>}, {pipeline_mode = #tpu.pipeline_mode<synchronous>, transform_indices = @transform_1, window_bounds = array<i64: 4, 8>}, {pipeline_mode = #tpu.pipeline_mode<synchronous>, transform_indices = @transform_2, window_bounds = array<i64: 1, 8>}, {pipeline_mode = #tpu.pipeline_mode<synchronous>, transform_indices = @transform_3, window_bounds = array<i64: 8, 4>}, {pipeline_mode = #tpu.pipeline_mode<synchronous>, transform_indices = @transform_4, window_bounds = array<i64: 1, 4>}, {transform_indices = @transform_5, window_bounds = array<i64: 2, 4, 256>}]} {
    %c0 = arith.constant 0 : index
    %c0_0 = arith.constant 0 : index
    %c0_1 = arith.constant 0 : index
    %0 = vector.load %arg1[%c0, %c0_0, %c0_1] : memref<2x4x256xf32, #tpu.memory_space<vmem>>, vector<2x4x256xf32>
    %cst = arith.constant dense<0.000000e+00> : vector<2x4xf32>
    %1 = vector.multi_reduction <add>, %0, %cst [2] : vector<2x4x256xf32> to vector<2x4xf32>
    %cst_2 = arith.constant 2.560000e+02 : f32
    %2 = vector.broadcast %cst_2 : f32 to vector<2x4xf32>
    %3 = arith.divf %1, %2 : vector<2x4xf32>
    %c0_3 = arith.constant 0 : index
    %c0_4 = arith.constant 0 : index
    %4 = vector.load %arg2[%c0_3, %c0_4] : memref<4x8xf32, #tpu.memory_space<vmem>>, vector<4x8xf32>
    %cst_5 = arith.constant dense<0.000000e+00> : vector<2x8xf32>
    %5 = tpu.matmul %3, %4, %cst_5 {dimension_numbers = #tpu.dot_dimension_numbers<[1], [0], [0], [1], [0, 0, 1, 1], [], []>} : vector<2x4xf32>, vector<4x8xf32>, vector<2x8xf32> -> vector<2x8xf32>
    %c0_6 = arith.constant 0 : index
    %c0_7 = arith.constant 0 : index
    %6 = vector.load %arg3[%c0_6, %c0_7] : memref<1x8xf32, #tpu.memory_space<vmem>>, vector<1x8xf32>
    %7 = vector.broadcast %6 : vector<1x8xf32> to vector<2x8xf32>
    %8 = arith.addf %5, %7 : vector<2x8xf32>
    %cst_8 = arith.constant 0.000000e+00 : f32
    %9 = vector.broadcast %cst_8 : f32 to vector<2x8xf32>
    %10 = arith.maximumf %8, %9 : vector<2x8xf32>
    %c0_9 = arith.constant 0 : index
    %c0_10 = arith.constant 0 : index
    %11 = vector.load %arg4[%c0_9, %c0_10] : memref<8x4xf32, #tpu.memory_space<vmem>>, vector<8x4xf32>
    %cst_11 = arith.constant dense<0.000000e+00> : vector<2x4xf32>
    %12 = tpu.matmul %10, %11, %cst_11 {dimension_numbers = #tpu.dot_dimension_numbers<[1], [0], [0], [1], [0, 0, 1, 1], [], []>} : vector<2x8xf32>, vector<8x4xf32>, vector<2x4xf32> -> vector<2x4xf32>
    %c0_12 = arith.constant 0 : index
    %c0_13 = arith.constant 0 : index
    %13 = vector.load %arg5[%c0_12, %c0_13] : memref<1x4xf32, #tpu.memory_space<vmem>>, vector<1x4xf32>
    %14 = vector.broadcast %13 : vector<1x4xf32> to vector<2x4xf32>
    %15 = arith.addf %12, %14 : vector<2x4xf32>
    %cst_14 = arith.constant 3.000000e+00 : f32
    %16 = vector.broadcast %cst_14 : f32 to vector<2x4xf32>
    %17 = arith.addf %15, %16 : vector<2x4xf32>
    %cst_15 = arith.constant 0.000000e+00 : f32
    %cst_16 = arith.constant 6.000000e+00 : f32
    %18 = vector.broadcast %cst_15 : f32 to vector<2x4xf32>
    %19 = arith.maximumf %18, %17 : vector<2x4xf32>
    %20 = vector.broadcast %cst_16 : f32 to vector<2x4xf32>
    %21 = arith.minimumf %20, %19 : vector<2x4xf32>
    %cst_17 = arith.constant 0.166666672 : f32
    %22 = vector.broadcast %cst_17 : f32 to vector<2x4xf32>
    %23 = arith.mulf %21, %22 : vector<2x4xf32>
    %24 = vector.shape_cast %23 : vector<2x4xf32> to vector<2x4x1xf32>
    %25 = vector.broadcast %24 : vector<2x4x1xf32> to vector<2x4x256xf32>
    %26 = arith.mulf %0, %25 : vector<2x4x256xf32>
    %c0_18 = arith.constant 0 : index
    %c0_19 = arith.constant 0 : index
    %c0_20 = arith.constant 0 : index
    %27 = vector.load %arg6[%c0_18, %c0_19, %c0_20] : memref<2x4x256xf32, #tpu.memory_space<vmem>>, vector<2x4x256xf32>
    tpu.vector_store %arg6[%c0_18, %c0_19, %c0_20], %26 {strides = array<i32>} : memref<2x4x256xf32, #tpu.memory_space<vmem>>, vector<2x4x256xf32>,
    return
  }
  func.func @transform_0(%arg0: i32) -> (i32, i32, i32) {
    %c0_i32 = arith.constant 0 : i32
    %c0_i32_0 = arith.constant 0 : i32
    %c0_i32_1 = arith.constant 0 : i32
    return %arg0, %c0_i32, %c0_i32_0 : i32, i32, i32
  }
  func.func @transform_1(%arg0: i32) -> (i32, i32) {
    %c0_i32 = arith.constant 0 : i32
    %c0_i32_0 = arith.constant 0 : i32
    %c0_i32_1 = arith.constant 0 : i32
    return %c0_i32, %c0_i32_0 : i32, i32
  }
  func.func @transform_2(%arg0: i32) -> (i32, i32) {
    %c0_i32 = arith.constant 0 : i32
    %c0_i32_0 = arith.constant 0 : i32
    %c0_i32_1 = arith.constant 0 : i32
    return %c0_i32, %c0_i32_0 : i32, i32
  }
  func.func @transform_3(%arg0: i32) -> (i32, i32) {
    %c0_i32 = arith.constant 0 : i32
    %c0_i32_0 = arith.constant 0 : i32
    %c0_i32_1 = arith.constant 0 : i32
    return %c0_i32, %c0_i32_0 : i32, i32
  }
  func.func @transform_4(%arg0: i32) -> (i32, i32) {
    %c0_i32 = arith.constant 0 : i32
    %c0_i32_0 = arith.constant 0 : i32
    %c0_i32_1 = arith.constant 0 : i32
    return %c0_i32, %c0_i32_0 : i32, i32
  }
  func.func @transform_5(%arg0: i32) -> (i32, i32, i32) {
    %c0_i32 = arith.constant 0 : i32
    %c0_i32_0 = arith.constant 0 : i32
    %c0_i32_1 = arith.constant 0 : i32
    return %arg0, %c0_i32, %c0_i32_0 : i32, i32, i32
  }
}

</mosaic_0001>

<bundles_post_ra>
// kernel: tpu_custom_call.1
= control target key start
LH: loop header
LB: loop body
LE: loop exit
PB: predicated region body
PF: predicated region fallthrough
CT: control target
= control target key end

     0   :  { %10 = vsyncpa [#allocation3], 0  ;;  %s467_s0 = inlined_call_operand.hbm [shape: f32[2,4,256], index: 0, kind: input, shape index: {}]   ;;  %s468_s1 = inlined_call_operand.vmem [shape: f32[4,8], index: 1, kind: input, shape index: {}]   ;;  %s469_s2 = inlined_call_operand.vmem [shape: f32[1,8], index: 2, kind: input, shape index: {}]   ;;  %s470_s3 = inlined_call_operand.vmem [shape: f32[8,4], index: 3, kind: input, shape index: {}]   ;;  %s471_s4 = inlined_call_operand.vmem [shape: f32[1,4], index: 4, kind: input, shape index: {}]   ;;  %s472_s5 = inlined_call_operand.hbm [shape: f32[2,4,256], index: 5, kind: output, shape index: {}]  }
   0x1   :  { %11 = vsyncpa [#allocation4], 0  ;;  %s371_s18 = smov [#allocation2]   ;;  %s323_s22 = scalar_lea.hbm %s467_s0, 256 }
   0x2   :  { %s17_s19 = sshll.u32 %s371_s18, 4  ;;  %p324_p0 = scmp.ne.s32.totalorder %s467_s0, %s323_s22  ;;  %s18_s19 = int_to_ptr.vmem [resolvable:$true] %s17_s19 }
   0x3   :  { %p327_p1 = scmp.lt.u32.totalorder %s323_s22, %s467_s0 }
   0x5   :  { %p329_p2 = pnand %p327_p1, %p324_p0 }
   0x7   :  { %332 = shalt.err (!%p329_p2)
}
   0x8   :  { %s333_s27 = scalar_lea.vmem %s18_s19, 256  ;;  %p338_p4 = scmp.lt.s32.totalorder %s18_s19, %s18_s19 }
   0x9   :  { %p334_p3 = scmp.ne.s32.totalorder %s18_s19, %s333_s27  ;;  %p339_p5 = scmp.lt.s32.totalorder %s333_s27, %s333_s27 }
   0xb   :  { %p340_p6 = por %p339_p5, %p338_p4 }
   0xd   :  { %p341_p7 = pnand %p340_p6, %p334_p3 }
   0xf   :  { %344 = shalt.err (!%p341_p7)
}
  0x10   :  { %s372_s28 = smov 128   ;;  %s373_s29 = smov 8  }
  0x11   :  { %23 = dma.hbm_to_vmem [thread:$0]  %s467_s0, 256, %s18_s19, [#allocation3], %s372_s28, %s372_s28, %s373_s29  }
  0x12   :  { %367 = dma.done.wait [#allocation3], 256  }
  0x13   :  { %368 = vsyncadd [#allocation3], 4294967040  ;;  %vm43_vm0 = vcmask 1043456   ;;  %v423_v0 = vld [vmem:[#allocation2] sm:$0xff]  ;;  %v425_v1 = vld [vmem:[#allocation2 + $0x8] sm:$0xff]  ;;  %v374_v11 = vmov 0.0   ;;  %v67_v12 = vlaneseq }
  0x14   :  { %v39_v2 = vcombine.high %v423_v0, %v423_v0  ;;  %v44_v3 = vsel %vm43_vm0, %v423_v0, 0.0  ;;  %v40_v4 = vcombine.high %v425_v1, %v425_v1  ;;  %v49_v6 = vsel %vm43_vm0, %v425_v1, 0.0  ;;  %v57_v10 = vld [vmem:[%s468_s1] sm:$0xf]  ;;  %304 = vmatprep.subr.mxu0 %v374_v11  ;;  %309 = vmatprep.subr.mxu1 %v374_v11 }
  0x15   :  { %vm375_vm1 = vmmov 0   ;;  %305 = vmatpush3.msk.msra.mxu0 %vm43_vm0, %v57_v10  ;;  %v68_v13 = vand.u32 127, %v67_v12  ;;  %v70_v14 = vshrl.u32 %v67_v12, 7  ;;  %vm77_vm2 = vcmask 1041409   ;;  %v156_v23 = vld [vmem:[%s470_s3] sm:$0xff] }
  0x16   :  { %v45_v5 = vsel %vm43_vm0, %v39_v2, 0.0  ;;  %v50_v7 = vsel %vm43_vm0, %v40_v4, 0.0  ;;  %306 = vmatprep.mubr.msk.f32.mxu0 %vm375_vm1, %v374_v11  ;;  %311 = vmatprep.mubr.msk.f32.mxu1 %vm375_vm1, %v374_v11  ;;  %vm79_vm3 = vcmask 31744   ;;  %v295_v24 = vld [vmem:[%s469_s2] ss:$0 sm:$0xff]  ;;  %vm164_vm4 = vcmask 64512  }
  0x17   :  { %v46_v8 = vadd.f32 %v45_v5, %v44_v3  ;;  %v51_v9 = vadd.f32 %v50_v7, %v49_v6  ;;  %v71_v16 = vsub.s32 %v68_v13, %v70_v14  ;;  %310 = vmatpush3.msra.mxu1 %v156_v23  ;;  %v298_v29 = vld [vmem:[%s471_s4] ss:$0 sm:$0xff]  ;;  %v244_v36 = vsub.s32 0, %v70_v14  ;;  %s377_s2 = smov [#allocation5]  }
  0x18   :  { %v251_v39 = vsub.s32 1, %v70_v14  ;;  %v376_v41 = vmov 839922192   ;;  %s283_s3 = sshll.u32 %s377_s2, 4  ;;  %s284_s3 = int_to_ptr.vmem [resolvable:$true] %s283_s3 }
  0x19   :  { %47 = vadd.xlane.f32.xlu0 %v46_v8  ;;  %v259_v42 = vunpack.c.l.s4 %v376_v41  ;;  %s345_s4 = scalar_lea.vmem %s284_s3, 256  ;;  %p350_p9 = scmp.lt.s32.totalorder %s284_s3, %s284_s3 }
  0x1a   :  { %p346_p8 = scmp.ne.s32.totalorder %s284_s3, %s345_s4  ;;  %p351_p10 = scmp.lt.s32.totalorder %s345_s4, %s345_s4 }
  0x1b   :  { %v260_v43 = vunpack.c.0.s8 %v259_v42 }
  0x1c   :  { %p352_p11 = por %p351_p10, %p350_p9 }
  0x1d   :  { %52 = vadd.xlane.f32.xlu0 %v51_v9  ;;  %v263_v44 = vsub.s32 %v260_v43, %v70_v14 }
  0x1e   :  { %p353_p12 = pnand %p352_p11, %p346_p8 }
  0xa6   :  { %v48_v15 = vpop.xlane.xlu0 %47 }
  0xa7   :  { %v55_v17 = vmul.f32 0.00390625, %v48_v15 }
  0xa9   :  { %v72_v20 = vrot.slane %v55_v17, %v71_v16 }
  0xaa   :  { %v53_v18 = vpop.xlane.xlu0 %52 }
  0xab   :  { %v56_v19 = vmul.f32 0.00390625, %v53_v18 }
  0xad   :  { %v76_v21 = vrot.slane %v56_v19, %v71_v16 }
  0xaf   :  { %v78_v22 = vsel %vm77_vm2, %v76_v21, %v72_v20 }
  0xb0   :  { %307 = vmatmul.mubr.msk.f32.vlgmr.msra.gmra.mrb[0].mxu0 %vm79_vm3, %v78_v22 }
 0x183   :  { %v151_v25 = vpop.f32.mrb[0].mxu0 }
 0x184   :  { %v152_v26 = vadd.f32 %v295_v24, %v151_v25  ;;  %v308_v27 = vpop.f32.mrb[1].mxu0 }
 0x186   :  { %v155_v28 = vmax.f32 %v152_v26, 0.0 }
 0x188   :  { %312 = vmatmul.mubr.msk.f32.vlgmr.msra.gmra.mrb[0].mxu1 %vm164_vm4, %v155_v28 }
 0x25b   :  { %v234_v30 = vpop.f32.mrb[0].mxu1 }
 0x25c   :  { %v235_v31 = vadd.f32 %v298_v29, %v234_v30  ;;  %v313_v32 = vpop.f32.mrb[1].mxu1 }
 0x25e   :  { %v238_v33 = vadd.f32 3.0, %v235_v31 }
 0x260   :  { %v239_v34 = vmax.f32 %v238_v33, 0.0 }
 0x262   :  { %v240_v35 = vmin.f32 %v239_v34, 6.0 }
 0x264   :  { %v241_v37 = vmul.f32 0.16666667, %v240_v35 }
 0x266   :  { %v245_v38 = vrot.slane %v241_v37, %v244_v36  ;;  %v252_v40 = vrot.slane %v241_v37, %v251_v39 }
 0x268   :  { %247 = vbcast.lane.b32.xlu1 %v245_v38, 256 }
 0x26c   :  { %254 = vbcast.lane.b32.xlu1 %v252_v40, 256 }
 0x2da   :  { %v248_v45 = vpop.permute.xlu1 %247 }
 0x2db   :  { %v264_v46 = vrot.slane %v248_v45, %v263_v44 }
 0x2dd   :  { %v274_v47 = vmul.f32 %v264_v46, %v423_v0 }
 0x2de   :  { %v255_v48 = vpop.permute.xlu1 %254 }
 0x2df   :  { %276 = vst [vmem:[#allocation5] sm:$0xff] %v274_v47  ;;  %v271_v49 = vrot.slane %v255_v48, %v263_v44 }
 0x2e1   :  { %v275_v50 = vmul.f32 %v271_v49, %v425_v1 }
 0x2e3   :  { %277 = vst [vmem:[#allocation5 + $0x8] sm:$0xff] %v275_v50 }
 0x2e4   :  { %356 = shalt.err (!%p353_p12)
}
 0x2e5   :  { %s357_s15 = scalar_lea.hbm %s472_s5, 256 }
 0x2e6   :  { %p358_p13 = scmp.ne.s32.totalorder %s472_s5, %s357_s15  ;;  %p361_p0 = scmp.lt.u32.totalorder %s357_s15, %s472_s5 }
 0x2e8   :  { %p363_p1 = pnand %p361_p0, %p358_p13 }
 0x2ea   :  { %366 = shalt.err (!%p363_p1)
}
 0x2eb   :  { %289 = dma.vmem_to_hbm [thread:$0]  %s284_s3, 256, %s472_s5, [#allocation4], %s372_s28, %s372_s28, %s373_s29  }
 0x2ec   :  { %369 = dma.done.wait [#allocation4], 256  }
 0x2ed   :  { %370 = vsyncadd [#allocation4], 4294967040 }
 0x2ee   :  { %293 = vsyncpa [#allocation3], 1 }
 0x2ef   :  { %294 = vsyncpa [#allocation4], 1 }

</bundles_post_ra>
